<compile_context>
chip_gen: v6e
topology: v6e:2x2x1
jax: 0.10.0
libtpu: 0.0.40
codegen_flags: <defaults>
</compile_context>

<pallas_src>
import functools

import jax
import jax.numpy as jnp
from jax import lax
from jax.experimental import pallas as pl
from jax.experimental.pallas import tpu as pltpu


# ----------------------------- exponent dispatch -----------------------------

def _int_pow(x, g):
    """Exact x**g for a static Python int g via square-and-multiply (VPU only)."""
    if g == 0:
        return jnp.ones_like(x)
    n = abs(g)
    result = None
    base = x
    while n:
        if n & 1:
            result = base if result is None else result * base
        n >>= 1
        if n:
            base = base * base
    if g < 0:
        result = jnp.ones((), dtype=x.dtype) / result   # exact divide (not approx)
    return result


def _apply_pow(x, gama):
    """Trace-time dispatch on the (static) exponent."""
    if isinstance(gama, (int, float)):
        gf = float(gama)
        if gf.is_integer():
            # Covers gama = 2, 3, -1, -2, 2.0, ... exactly (valid for negative bases).
            return _int_pow(x, int(gf))
        if gf == 0.5:
            return jnp.sqrt(x)
        if gf == -0.5:
            return lax.rsqrt(x)
        return jnp.power(x, jnp.asarray(gf, dtype=x.dtype))
    # Non-static exponent (traced array): general path.
    return jnp.power(x, gama)


# --------------------------------- kernel ------------------------------------

def _pow_kernel(x_ref, o_ref, *, gama):
    x = x_ref[...]
    o_ref[...] = _apply_pow(x, gama).astype(o_ref.dtype)


# --------------------------------- wrapper -----------------------------------

def pallas_pow(x, gama=2, target_block_bytes=4 << 20):
    """Elementwise x ** gama via a tiled Pallas TPU kernel.

    Flattens `x` to a lane-dense 2D slab with (when possible) zero-copy reshape,
    streams it through large (~target_block_bytes) VMEM blocks, and reshapes
    back to the original shape.
    """
    orig_shape = x.shape
    dtype = x.dtype
    n = x.size
    if n == 0:
        return x

    itemsize = jnp.dtype(dtype).itemsize
    # Sublane packing multiple for the row dimension: 8 (f32), 16 (bf16), 32 (int8).
    sub = max(8, 32 // itemsize)

    # Pick the widest lane count that divides n so the reshape is a free view.
    cols = None
    for c in (1024, 512, 256, 128):
        if n % c == 0:
            cols = c
            break
    if cols is None:
        cols = 128
        pad = (-n) % cols          # minimal padding (< 128 elements)
    else:
        pad = 0

    x_flat = x.reshape(-1)
    if pad:
        x_flat = jnp.pad(x_flat, (0, pad))
    rows = (n + pad) // cols
    x2d = x_flat.reshape(rows, cols)

    # Block sizing: ~target_block_bytes per block, rows a multiple of `sub`.
    target_rows = max(sub, (target_block_bytes // (cols * itemsize) // sub) * sub)
    if rows <= target_rows:
        tile_rows = rows           # single block == full array (layout rule satisfied)
    else:
        tile_rows = target_rows    # large arrays => grid >= 2 (feeds both v7x TCs)
    grid = (pl.cdiv(rows, tile_rows),)

    block_bytes = tile_rows * cols * itemsize
    # 2 operands x double buffering + headroom; >= 32 MiB so v5e's 16 MiB default
    # scoped limit is lifted, still well under v7x's 64 MiB physical VMEM for the
    # default 4 MiB blocks.
    vmem_limit = int(max(32 << 20, 4 * block_bytes + (2 << 20)))

    out2d = pl.pallas_call(
        functools.partial(_pow_kernel, gama=gama),
        out_shape=jax.ShapeDtypeStruct((rows, cols), dtype),
        grid_spec=pltpu.PrefetchScalarGridSpec(
            num_scalar_prefetch=0,
            grid=grid,
            in_specs=[pl.BlockSpec((tile_rows, cols), lambda i: (i, 0))],
            out_specs=pl.BlockSpec((tile_rows, cols), lambda i: (i, 0)),
        ),
        compiler_params=pltpu.CompilerParams(
            dimension_semantics=("parallel",),
            vmem_limit_bytes=vmem_limit,
        ),
    )(x2d)

    if pad:
        return out2d.reshape(-1)[:n].reshape(orig_shape)
    return out2d.reshape(orig_shape)


# ----------------------------------- test ------------------------------------

if __name__ == "__main__":
    key = jax.random.PRNGKey(0)

    # Default module usage: gama=2 on a small NCHW feature map.
    x = jax.random.normal(key, (2, 4, 16, 16), dtype=jnp.float32)
    out = pallas_pow(x, gama=2)
    jax.block_until_ready(out)
    ref = x * x
    assert out.shape == x.shape and out.dtype == x.dtype
    assert jnp.allclose(out, ref, atol=1e-6, rtol=1e-6)

    # Non-128-divisible size + tiny block budget: exercises the pad path,
    # multi-step grid, and the partial last block.
    k1, k2 = jax.random.split(key)
    x2 = jax.random.normal(k1, (1, 1, 200, 130), dtype=jnp.float32)
    out2 = pallas_pow(x2, gama=3, target_block_bytes=16 * 1024)
    jax.block_until_ready(out2)
    assert jnp.allclose(out2, x2 * x2 * x2, atol=1e-5, rtol=1e-5)

    # Negative integer exponent on strictly positive inputs (exact multiply+divide path).
    x3 = jax.random.uniform(k2, (2, 4, 16, 16), dtype=jnp.float32, minval=0.5, maxval=2.0)
    out3 = pallas_pow(x3, gama=-2)
    jax.block_until_ready(out3)
    assert jnp.allclose(out3, 1.0 / (x3 * x3), atol=1e-5, rtol=1e-5)

    print("KERNEL_OK")
</pallas_src>

<mosaic_0001>
module attributes {stable_mosaic.version = 11 : i64} {
  func.func @_pow_kernel(%arg0: i32, %arg1: memref<2x1024xf32, #tpu.memory_space<vmem>>, %arg2: memref<2x1024xf32, #tpu.memory_space<vmem>>) attributes {dimension_semantics = [#tpu.dimension_semantics<parallel>], iteration_bounds = array<i64: 1>, scalar_prefetch = 0 : i64, scratch_operands = 0 : i64, tpu.core_type = #tpu.core_type<tc>, window_params = [{transform_indices = @transform_0, window_bounds = array<i64: 2, 1024>}, {transform_indices = @transform_1, window_bounds = array<i64: 2, 1024>}]} {
    %c0 = arith.constant 0 : index
    %c0_0 = arith.constant 0 : index
    %0 = vector.load %arg1[%c0, %c0_0] : memref<2x1024xf32, #tpu.memory_space<vmem>>, vector<2x1024xf32>
    %1 = arith.mulf %0, %0 : vector<2x1024xf32>
    %c0_1 = arith.constant 0 : index
    %c0_2 = arith.constant 0 : index
    %2 = vector.load %arg2[%c0_1, %c0_2] : memref<2x1024xf32, #tpu.memory_space<vmem>>, vector<2x1024xf32>
    tpu.vector_store %arg2[%c0_1, %c0_2], %1 {strides = array<i32>} : memref<2x1024xf32, #tpu.memory_space<vmem>>, vector<2x1024xf32>,
    return
  }
  func.func @transform_0(%arg0: i32) -> (i32, i32) {
    %c0_i32 = arith.constant 0 : i32
    %c0_i32_0 = arith.constant 0 : i32
    return %arg0, %c0_i32 : i32, i32
  }
  func.func @transform_1(%arg0: i32) -> (i32, i32) {
    %c0_i32 = arith.constant 0 : i32
    %c0_i32_0 = arith.constant 0 : i32
    return %arg0, %c0_i32 : i32, i32
  }
}

</mosaic_0001>

<bundles_post_ra>
// kernel: tpu_custom_call.1
= control target key start
LH: loop header
LB: loop body
LE: loop exit
PB: predicated region body
PF: predicated region fallthrough
CT: control target
= control target key end

     0   :  { %6 = vsyncpa [#allocation3], 0  ;;  %s106_s0 = inlined_call_operand.hbm [shape: f32[2,1024], index: 0, kind: input, shape index: {}]   ;;  %s107_s1 = inlined_call_operand.hbm [shape: f32[2,1024], index: 1, kind: output, shape index: {}]  }
   0x1   :  { %7 = vsyncpa [#allocation4], 0  ;;  %s88_s6 = smov [#allocation2]  }
   0x2   :  { %s14_s7 = sshll.u32 %s88_s6, 4  ;;  %s15_s7 = int_to_ptr.vmem [resolvable:$true] %s14_s7 }
   0x3   :  { %s52_s8 = scalar_lea.vmem %s15_s7, 256  ;;  %p57_p1 = scmp.lt.s32.totalorder %s15_s7, %s15_s7 }
   0x4   :  { %p53_p0 = scmp.ne.s32.totalorder %s15_s7, %s52_s8  ;;  %p58_p2 = scmp.lt.s32.totalorder %s52_s8, %s52_s8 }
   0x6   :  { %p59_p3 = por %p58_p2, %p57_p1 }
   0x8   :  { %p60_p4 = pnand %p59_p3, %p53_p0 }
   0xa   :  { %63 = shalt.err (!%p60_p4)
}
   0xb   :  { %17 = dma.hbm_to_vmem [thread:$0]  %s106_s0, 256, %s15_s7, [#allocation3]  }
   0xc   :  { %84 = dma.done.wait [#allocation3], 256  }
   0xd   :  { %85 = vsyncadd [#allocation3], 4294967040  ;;  %s89_s11 = smov [#allocation5]   ;;  %v21_v0 = vld [vmem:[#allocation2] sm:$0xff]  ;;  %v22_v1 = vld [vmem:[#allocation2 + $0x8] sm:$0xff] }
   0xe   :  { %s33_s12 = sshll.u32 %s89_s11, 4  ;;  %v23_v2 = vmul.f32 %v21_v0, %v21_v0  ;;  %v24_v3 = vmul.f32 %v22_v1, %v22_v1  ;;  %s34_s12 = int_to_ptr.vmem [resolvable:$true] %s33_s12 }
   0xf   :  { %s64_s13 = scalar_lea.vmem %s34_s12, 256  ;;  %p69_p6 = scmp.lt.s32.totalorder %s34_s12, %s34_s12 }
  0x10   :  { %25 = vst [vmem:[#allocation5] sm:$0xff] %v23_v2  ;;  %26 = vst [vmem:[#allocation5 + $0x8] sm:$0xff] %v24_v3  ;;  %p65_p5 = scmp.ne.s32.totalorder %s34_s12, %s64_s13  ;;  %p70_p7 = scmp.lt.s32.totalorder %s64_s13, %s64_s13 }
  0x12   :  { %p71_p8 = por %p70_p7, %p69_p6 }
  0x14   :  { %p72_p9 = pnand %p71_p8, %p65_p5 }
  0x16   :  { %75 = shalt.err (!%p72_p9)
}
  0x17   :  { %36 = dma.vmem_to_hbm [thread:$0]  %s34_s12, 256, %s107_s1, [#allocation4]  }
  0x18   :  { %86 = dma.done.wait [#allocation4], 256  }
  0x19   :  { %87 = vsyncadd [#allocation4], 4294967040 }
  0x1a   :  { %40 = vsyncpa [#allocation3], 1 }
  0x1b   :  { %41 = vsyncpa [#allocation4], 1 }

</bundles_post_ra>
